<compile_context>
chip_gen: v7x
topology: tpu7x:2x2x1
jax: 0.10.0
libtpu: 0.0.40
codegen_flags: <defaults>
</compile_context>

<pallas_src>
import functools
import math

import jax
import jax.numpy as jnp
from jax import lax
from jax.experimental import pallas as pl
from jax.experimental.pallas import tpu as pltpu

N_EMBD = 32
N_HEAD = 4
LN_EPS = 1e-5
NEG_INF = -1e30   # finite "minus infinity" -> no NaN from exp() on fully-masked entries


def _layer_norm(h, gamma, beta):
    mu = jnp.mean(h, axis=-1, keepdims=True)
    var = jnp.mean((h - mu) ** 2, axis=-1, keepdims=True)
    return (h - mu) * lax.rsqrt(var + LN_EPS) * gamma + beta


def _gelu_tanh(x):
    c = math.sqrt(2.0 / math.pi)
    return 0.5 * x * (1.0 + jnp.tanh(c * (x + 0.044715 * x * x * x)))


def block_kernel(x_ref, vec_ref, w_ref, wfp_ref, o_ref, *, batch, n_head, matmul_dtype):
    x = x_ref[...]                                  # (B*T, C) f32
    BT, C = x.shape
    T = BT // batch
    hd = C // n_head

    def mm(a, b):                                   # 2-D MXU matmul, f32 accumulate
        return jnp.dot(a.astype(matmul_dtype), b.astype(matmul_dtype),
                       preferred_element_type=jnp.float32)

    # ---- small params: one (8, lane) f32 slab (1 DMA) ----
    ln1g = vec_ref[0:1, 0:C]
    ln1b = vec_ref[1:2, 0:C]
    ln2g = vec_ref[2:3, 0:C]
    ln2b = vec_ref[3:4, 0:C]
    bqkv = vec_ref[4:5, 0:3 * C]
    bpr = vec_ref[5:6, 0:C]
    bfc = vec_ref[6:7, 0:4 * C]
    bfp = vec_ref[7:8, 0:C]

    # ---- matmul weights: one lane-concatenated slab + the (4C, C) down-projection ----
    wqkv = w_ref[:, 0:3 * C]                        # (C, 3C), 1/sqrt(hd) folded into q cols
    wpr = w_ref[:, 3 * C:4 * C]                     # (C, C)
    wfc = w_ref[:, 4 * C:8 * C]                     # (C, 4C)
    wfp = wfp_ref[...]                              # (4C, C)

    # ---------- x + sa(ln1(x)) ----------
    h1 = _layer_norm(x, ln1g, ln1b)                 # (B*T, C) f32
    qkv = mm(h1, wqkv) + bqkv                       # (B*T, 3C): ONE wide MXU matmul

    q = qkv[:, 0:C]                                 # (B*T, C)
    kT = qkv[:, C:2 * C].T                          # (C, B*T): single transpose; per-head kT
                                                    #           blocks become free row slices
    v = qkv[:, 2 * C:3 * C]

    qm = q.astype(matmul_dtype)
    kTm = kT.astype(matmul_dtype)
    vm = v.astype(matmul_dtype)
    qh = jnp.stack([qm[:, h * hd:(h + 1) * hd] for h in range(n_head)], axis=0)    # (H, BT, hd)
    kTh = jnp.stack([kTm[h * hd:(h + 1) * hd, :] for h in range(n_head)], axis=0)  # (H, hd, BT)
    vh = jnp.stack([vm[:, h * hd:(h + 1) * hd] for h in range(n_head)], axis=0)    # (H, BT, hd)

    # Block-diagonal causal additive bias over the fused (B*T) row axis: keys must be in the
    # same batch element AND at position <= the query position.
    tq = lax.broadcasted_iota(jnp.int32, (T, T), 0)
    tk = lax.broadcasted_iota(jnp.int32, (T, T), 1)
    causal = jnp.where(tk <= tq, 0.0, NEG_INF).astype(jnp.float32)       # (T, T)
    neg = jnp.full((T, T), NEG_INF, jnp.float32)
    bias = jnp.concatenate(
        [jnp.concatenate([causal if j == i else neg for j in range(batch)], axis=1)
         for i in range(batch)], axis=0)                                 # (B*T, B*T)

    # Head-batched scores / attention: canonical (q,d)@(d,k) and (q,k)@(k,d) contractions,
    # single leading batch (head) axis, f32 accumulation.
    s = jnp.einsum('hqd,hdk->hqk', qh, kTh,
                   preferred_element_type=jnp.float32) + bias[None]      # (H, BT, BT)
    m = jnp.max(s, axis=-1, keepdims=True)
    p = jnp.exp(s - m)
    den = jnp.sum(p, axis=-1, keepdims=True)
    if matmul_dtype == jnp.float32:
        p = p / den                                   # exact divide in the tight-check mode
    else:
        p = p * pl.reciprocal(den, approx=True)       # EUP slot, off the VALU
    o = jnp.einsum('hqk,hkd->hqd', p.astype(matmul_dtype), vh,
                   preferred_element_type=jnp.float32)                   # (H, BT, hd)

    # Concat heads along lanes; the cross-head sum is fused into the (BT,C)@(C,C) MXU
    # contraction of the output projection (no VALU add chain, no (H,T,C) intermediate).
    o_cat = jnp.concatenate([o[h] for h in range(n_head)], axis=-1)      # (BT, C) f32
    y = mm(o_cat, wpr) + bpr
    x1 = x + y

    # ---------- x + ffwd(ln2(x)) ----------
    h2 = _layer_norm(x1, ln2g, ln2b)
    f = mm(h2, wfc) + bfc
    f = _gelu_tanh(f)
    f = mm(f, wfp) + bfp

    o_ref[...] = (x1 + f).astype(o_ref.dtype)


def prepare_params(params, n_head=N_HEAD, matmul_dtype=jnp.bfloat16):
    """Repack PyTorch-layout params into 3 consolidated kernel inputs."""
    (ln1g, ln1b, wqkv, bqkv, wpr, bpr, ln2g, ln2b, wfc, bfc, wfp, bfp) = params
    C = wqkv.shape[0]
    hd = C // n_head
    scale = 1.0 / math.sqrt(hd)

    # Fold the attention 1/sqrt(hd) scale into Wq and bq (host side, zero kernel cost).
    wqkv_s = jnp.concatenate([wqkv[:, :C] * scale, wqkv[:, C:]], axis=1)
    bqkv_s = jnp.concatenate([bqkv[:, :C] * scale, bqkv[:, C:]], axis=1)

    # Small-vector slab: LN params + all biases in one (8, lane) f32 array (single DMA).
    lane = max(128, 4 * C)

    def row(vv):
        return jnp.pad(vv.astype(jnp.float32), ((0, 0), (0, lane - vv.shape[1])))

    vec = jnp.concatenate([row(ln1g), row(ln1b), row(ln2g), row(ln2b),
                           row(bqkv_s), row(bpr), row(bfc), row(bfp)], axis=0)   # (8, lane)

    # Matmul-weight slab: lane-concat of all (C, *) weights (single DMA); MXU operands in
    # matmul_dtype (bf16 default halves DMA/VMEM bytes on every TPU generation).
    w_slab = jnp.concatenate([wqkv_s, wpr, wfc], axis=1).astype(matmul_dtype)    # (C, 8C)
    wfp_m = wfp.astype(matmul_dtype)                                             # (4C, C)
    return (vec, w_slab, wfp_m)


def block_forward(x, params, n_head=N_HEAD, matmul_dtype=jnp.bfloat16):
    B, T, C = x.shape
    vec, w_slab, wfp_m = prepare_params(params, n_head, matmul_dtype)
    x_flat = x.reshape(B * T, C)

    kernel = functools.partial(block_kernel, batch=B, n_head=n_head,
                               matmul_dtype=matmul_dtype)
    vmem = pl.BlockSpec(memory_space=pltpu.MemorySpace.VMEM)   # whole array, resident in VMEM
    out = pl.pallas_call(
        kernel,
        out_shape=jax.ShapeDtypeStruct((B * T, C), x.dtype),
        in_specs=[vmem] * 4,
        out_specs=vmem,
    )(x_flat, vec, w_slab, wfp_m)
    return out.reshape(B, T, C)


def init_params(key, n_embd=N_EMBD):
    ks = jax.random.split(key, 8)
    s = 0.02
    ln1g = jnp.ones((1, n_embd), jnp.float32)
    ln1b = jnp.zeros((1, n_embd), jnp.float32)
    # attention: c_attn (n_embd -> 3*n_embd), c_proj (n_embd -> n_embd), weights as (in, out)
    wqkv = (jax.random.normal(ks[0], (n_embd, 3 * n_embd)) * s).astype(jnp.float32)
    bqkv = (jax.random.normal(ks[1], (1, 3 * n_embd)) * s).astype(jnp.float32)
    wpr = (jax.random.normal(ks[2], (n_embd, n_embd)) * s).astype(jnp.float32)
    bpr = (jax.random.normal(ks[3], (1, n_embd)) * s).astype(jnp.float32)
    ln2g = jnp.ones((1, n_embd), jnp.float32)
    ln2b = jnp.zeros((1, n_embd), jnp.float32)
    # MLP: c_fc (n_embd -> 4*n_embd), c_proj (4*n_embd -> n_embd)
    wfc = (jax.random.normal(ks[4], (n_embd, 4 * n_embd)) * s).astype(jnp.float32)
    bfc = (jax.random.normal(ks[5], (1, 4 * n_embd)) * s).astype(jnp.float32)
    wfp = (jax.random.normal(ks[6], (4 * n_embd, n_embd)) * s).astype(jnp.float32)
    bfp = (jax.random.normal(ks[7], (1, n_embd)) * s).astype(jnp.float32)
    return (ln1g, ln1b, wqkv, bqkv, wpr, bpr, ln2g, ln2b, wfc, bfc, wfp, bfp)


def block_reference(x, params, n_head=N_HEAD):
    """Pure-JAX reference mirroring the PyTorch module."""
    (ln1g, ln1b, wqkv, bqkv, wpr, bpr, ln2g, ln2b, wfc, bfc, wfp, bfp) = params
    B, T, C = x.shape
    hd = C // n_head

    def ln(h, g, b):
        mu = jnp.mean(h, -1, keepdims=True)
        var = jnp.mean((h - mu) ** 2, -1, keepdims=True)
        return (h - mu) * lax.rsqrt(var + LN_EPS) * g + b

    h1 = ln(x, ln1g, ln1b)
    qkv = h1 @ wqkv + bqkv
    q, k, v = jnp.split(qkv, 3, axis=-1)
    q = q.reshape(B, T, n_head, hd).transpose(0, 2, 1, 3)
    k = k.reshape(B, T, n_head, hd).transpose(0, 2, 1, 3)
    v = v.reshape(B, T, n_head, hd).transpose(0, 2, 1, 3)
    s = jnp.einsum('bhtd,bhsd->bhts', q, k) / math.sqrt(hd)
    mask = jnp.tril(jnp.ones((T, T), bool))
    s = jnp.where(mask, s, -jnp.inf)
    p = jax.nn.softmax(s, axis=-1)
    y = jnp.einsum('bhts,bhsd->bhtd', p, v).transpose(0, 2, 1, 3).reshape(B, T, C)
    x1 = x + (y @ wpr + bpr)
    h2 = ln(x1, ln2g, ln2b)
    f = _gelu_tanh(h2 @ wfc + bfc) @ wfp + bfp
    return x1 + f


if __name__ == "__main__":
    key = jax.random.PRNGKey(0)
    kx, kp = jax.random.split(key)
    B, T, C = 2, 8, N_EMBD
    x = jax.random.normal(kx, (B, T, C), jnp.float32)
    params = init_params(kp, C)

    ref = block_reference(x, params)

    # f32 MXU operands + exact softmax divide -- tight check.
    out_f32 = jax.block_until_ready(block_forward(x, params, matmul_dtype=jnp.float32))
    assert jnp.allclose(out_f32, ref, atol=1e-4, rtol=1e-4), "f32 kernel mismatch vs reference"

    # Default path: bf16 MXU operands (f32 accumulation + f32 LayerNorm/softmax/GELU),
    # recommended on v5e/v6e/v7x -- tolerance widened for bf16 operand rounding.
    out_bf16 = jax.block_until_ready(block_forward(x, params))
    assert jnp.allclose(out_bf16, ref, atol=2e-2, rtol=2e-2), "bf16 kernel mismatch vs reference"

    print("KERNEL_OK")
</pallas_src>

<mosaic_0001>
module attributes {stable_mosaic.version = 11 : i64} {
  func.func @block_kernel(%arg0: memref<16x32xf32, #tpu.memory_space<vmem>>, %arg1: memref<8x128xf32, #tpu.memory_space<vmem>>, %arg2: memref<32x256xf32, #tpu.memory_space<vmem>>, %arg3: memref<128x32xf32, #tpu.memory_space<vmem>>, %arg4: memref<16x32xf32, #tpu.memory_space<vmem>>) attributes {dimension_semantics = [], scalar_prefetch = 0 : i64, scratch_operands = 0 : i64, tpu.core_type = #tpu.core_type<tc>} {
    %c0 = arith.constant 0 : index
    %c0_0 = arith.constant 0 : index
    %0 = vector.load %arg0[%c0, %c0_0] : memref<16x32xf32, #tpu.memory_space<vmem>>, vector<16x32xf32>
    %c0_1 = arith.constant 0 : index
    %c0_2 = arith.constant 0 : index
    %1 = vector.load %arg1[%c0_1, %c0_2] : memref<8x128xf32, #tpu.memory_space<vmem>>, vector<1x32xf32>
    %c1 = arith.constant 1 : index
    %c0_3 = arith.constant 0 : index
    %2 = vector.load %arg1[%c1, %c0_3] : memref<8x128xf32, #tpu.memory_space<vmem>>, vector<1x32xf32>
    %c2 = arith.constant 2 : index
    %c0_4 = arith.constant 0 : index
    %3 = vector.load %arg1[%c2, %c0_4] : memref<8x128xf32, #tpu.memory_space<vmem>>, vector<1x32xf32>
    %c3 = arith.constant 3 : index
    %c0_5 = arith.constant 0 : index
    %4 = vector.load %arg1[%c3, %c0_5] : memref<8x128xf32, #tpu.memory_space<vmem>>, vector<1x32xf32>
    %c4 = arith.constant 4 : index
    %c0_6 = arith.constant 0 : index
    %5 = vector.load %arg1[%c4, %c0_6] : memref<8x128xf32, #tpu.memory_space<vmem>>, vector<1x96xf32>
    %c5 = arith.constant 5 : index
    %c0_7 = arith.constant 0 : index
    %6 = vector.load %arg1[%c5, %c0_7] : memref<8x128xf32, #tpu.memory_space<vmem>>, vector<1x32xf32>
    %c6 = arith.constant 6 : index
    %c0_8 = arith.constant 0 : index
    %7 = vector.load %arg1[%c6, %c0_8] : memref<8x128xf32, #tpu.memory_space<vmem>>, vector<1x128xf32>
    %c7 = arith.constant 7 : index
    %c0_9 = arith.constant 0 : index
    %8 = vector.load %arg1[%c7, %c0_9] : memref<8x128xf32, #tpu.memory_space<vmem>>, vector<1x32xf32>
    %c0_10 = arith.constant 0 : index
    %c0_11 = arith.constant 0 : index
    %9 = vector.load %arg2[%c0_10, %c0_11] : memref<32x256xf32, #tpu.memory_space<vmem>>, vector<32x96xf32>
    %c0_12 = arith.constant 0 : index
    %c96 = arith.constant 96 : index
    %10 = vector.load %arg2[%c0_12, %c96] : memref<32x256xf32, #tpu.memory_space<vmem>>, vector<32x32xf32>
    %c0_13 = arith.constant 0 : index
    %c128 = arith.constant 128 : index
    %11 = vector.load %arg2[%c0_13, %c128] : memref<32x256xf32, #tpu.memory_space<vmem>>, vector<32x128xf32>
    %c0_14 = arith.constant 0 : index
    %c0_15 = arith.constant 0 : index
    %12 = vector.load %arg3[%c0_14, %c0_15] : memref<128x32xf32, #tpu.memory_space<vmem>>, vector<128x32xf32>
    %cst = arith.constant dense<0.000000e+00> : vector<16xf32>
    %13 = vector.multi_reduction <add>, %0, %cst [1] : vector<16x32xf32> to vector<16xf32>
    %14 = vector.shape_cast %13 : vector<16xf32> to vector<16x1xf32>
    %cst_16 = arith.constant 3.200000e+01 : f32
    %15 = vector.broadcast %cst_16 : f32 to vector<16x1xf32>
    %16 = arith.divf %14, %15 : vector<16x1xf32>
    %17 = vector.broadcast %16 : vector<16x1xf32> to vector<16x32xf32>
    %18 = arith.subf %0, %17 : vector<16x32xf32>
    %19 = arith.mulf %18, %18 : vector<16x32xf32>
    %cst_17 = arith.constant dense<0.000000e+00> : vector<16xf32>
    %20 = vector.multi_reduction <add>, %19, %cst_17 [1] : vector<16x32xf32> to vector<16xf32>
    %21 = vector.shape_cast %20 : vector<16xf32> to vector<16x1xf32>
    %cst_18 = arith.constant 3.200000e+01 : f32
    %22 = vector.broadcast %cst_18 : f32 to vector<16x1xf32>
    %23 = arith.divf %21, %22 : vector<16x1xf32>
    %24 = vector.broadcast %16 : vector<16x1xf32> to vector<16x32xf32>
    %25 = arith.subf %0, %24 : vector<16x32xf32>
    %cst_19 = arith.constant 9.99999974E-6 : f32
    %26 = vector.broadcast %cst_19 : f32 to vector<16x1xf32>
    %27 = arith.addf %23, %26 : vector<16x1xf32>
    %28 = math.rsqrt %27 : vector<16x1xf32>
    %29 = vector.broadcast %28 : vector<16x1xf32> to vector<16x32xf32>
    %30 = arith.mulf %25, %29 : vector<16x32xf32>
    %31 = vector.broadcast %1 : vector<1x32xf32> to vector<16x32xf32>
    %32 = arith.mulf %30, %31 : vector<16x32xf32>
    %33 = vector.broadcast %2 : vector<1x32xf32> to vector<16x32xf32>
    %34 = arith.addf %32, %33 : vector<16x32xf32>
    %cst_20 = arith.constant dense<0.000000e+00> : vector<16x96xf32>
    %35 = tpu.matmul %34, %9, %cst_20 {dimension_numbers = #tpu.dot_dimension_numbers<[1], [0], [0], [1], [0, 0, 1, 1], [], []>} : vector<16x32xf32>, vector<32x96xf32>, vector<16x96xf32> -> vector<16x96xf32>
    %36 = vector.broadcast %5 : vector<1x96xf32> to vector<16x96xf32>
    %37 = arith.addf %35, %36 : vector<16x96xf32>
    %38 = vector.extract_strided_slice %37 {offsets = [0, 0], sizes = [16, 32], strides = [1, 1]} : vector<16x96xf32> to vector<16x32xf32>
    %39 = vector.extract_strided_slice %37 {offsets = [0, 32], sizes = [16, 32], strides = [1, 1]} : vector<16x96xf32> to vector<16x32xf32>
    %40 = tpu.transpose %39, [1, 0] : vector<16x32xf32> -> vector<32x16xf32>
    %41 = vector.extract_strided_slice %37 {offsets = [0, 64], sizes = [16, 32], strides = [1, 1]} : vector<16x96xf32> to vector<16x32xf32>
    %42 = vector.extract_strided_slice %38 {offsets = [0, 0], sizes = [16, 8], strides = [1, 1]} : vector<16x32xf32> to vector<16x8xf32>
    %43 = vector.extract_strided_slice %38 {offsets = [0, 8], sizes = [16, 8], strides = [1, 1]} : vector<16x32xf32> to vector<16x8xf32>
    %44 = vector.extract_strided_slice %38 {offsets = [0, 16], sizes = [16, 8], strides = [1, 1]} : vector<16x32xf32> to vector<16x8xf32>
    %45 = vector.extract_strided_slice %38 {offsets = [0, 24], sizes = [16, 8], strides = [1, 1]} : vector<16x32xf32> to vector<16x8xf32>
    %46 = vector.shape_cast %42 : vector<16x8xf32> to vector<1x16x8xf32>
    %47 = vector.shape_cast %43 : vector<16x8xf32> to vector<1x16x8xf32>
    %48 = vector.shape_cast %44 : vector<16x8xf32> to vector<1x16x8xf32>
    %49 = vector.shape_cast %45 : vector<16x8xf32> to vector<1x16x8xf32>
    %50 = tpu.concatenate %46, %47, %48, %49 in 0 : vector<1x16x8xf32>, vector<1x16x8xf32>, vector<1x16x8xf32>, vector<1x16x8xf32> -> vector<4x16x8xf32>
    %51 = vector.extract_strided_slice %40 {offsets = [0, 0], sizes = [8, 16], strides = [1, 1]} : vector<32x16xf32> to vector<8x16xf32>
    %52 = vector.extract_strided_slice %40 {offsets = [8, 0], sizes = [8, 16], strides = [1, 1]} : vector<32x16xf32> to vector<8x16xf32>
    %53 = vector.extract_strided_slice %40 {offsets = [16, 0], sizes = [8, 16], strides = [1, 1]} : vector<32x16xf32> to vector<8x16xf32>
    %54 = vector.extract_strided_slice %40 {offsets = [24, 0], sizes = [8, 16], strides = [1, 1]} : vector<32x16xf32> to vector<8x16xf32>
    %55 = vector.shape_cast %51 : vector<8x16xf32> to vector<1x8x16xf32>
    %56 = vector.shape_cast %52 : vector<8x16xf32> to vector<1x8x16xf32>
    %57 = vector.shape_cast %53 : vector<8x16xf32> to vector<1x8x16xf32>
    %58 = vector.shape_cast %54 : vector<8x16xf32> to vector<1x8x16xf32>
    %59 = tpu.concatenate %55, %56, %57, %58 in 0 : vector<1x8x16xf32>, vector<1x8x16xf32>, vector<1x8x16xf32>, vector<1x8x16xf32> -> vector<4x8x16xf32>
    %60 = vector.extract_strided_slice %41 {offsets = [0, 0], sizes = [16, 8], strides = [1, 1]} : vector<16x32xf32> to vector<16x8xf32>
    %61 = vector.extract_strided_slice %41 {offsets = [0, 8], sizes = [16, 8], strides = [1, 1]} : vector<16x32xf32> to vector<16x8xf32>
    %62 = vector.extract_strided_slice %41 {offsets = [0, 16], sizes = [16, 8], strides = [1, 1]} : vector<16x32xf32> to vector<16x8xf32>
    %63 = vector.extract_strided_slice %41 {offsets = [0, 24], sizes = [16, 8], strides = [1, 1]} : vector<16x32xf32> to vector<16x8xf32>
    %64 = vector.shape_cast %60 : vector<16x8xf32> to vector<1x16x8xf32>
    %65 = vector.shape_cast %61 : vector<16x8xf32> to vector<1x16x8xf32>
    %66 = vector.shape_cast %62 : vector<16x8xf32> to vector<1x16x8xf32>
    %67 = vector.shape_cast %63 : vector<16x8xf32> to vector<1x16x8xf32>
    %68 = tpu.concatenate %64, %65, %66, %67 in 0 : vector<1x16x8xf32>, vector<1x16x8xf32>, vector<1x16x8xf32>, vector<1x16x8xf32> -> vector<4x16x8xf32>
    %69 = tpu.iota {dimensions = array<i32: 0>} : vector<8x8xi32>
    %70 = tpu.iota {dimensions = array<i32: 1>} : vector<8x8xi32>
    %71 = arith.cmpi sle, %70, %69 : vector<8x8xi32>
    %cst_21 = arith.constant 0.000000e+00 : f32
    %cst_22 = arith.constant -1.000000e+30 : f32
    %72 = vector.broadcast %cst_21 : f32 to vector<8x8xf32>
    %73 = vector.broadcast %cst_22 : f32 to vector<8x8xf32>
    %74 = arith.select %71, %72, %73 : vector<8x8xi1>, vector<8x8xf32>
    %cst_23 = arith.constant -1.000000e+30 : f32
    %75 = vector.broadcast %cst_23 : f32 to vector<8x8xf32>
    %76 = tpu.concatenate %74, %75 in 1 : vector<8x8xf32>, vector<8x8xf32> -> vector<8x16xf32>
    %77 = tpu.concatenate %75, %74 in 1 : vector<8x8xf32>, vector<8x8xf32> -> vector<8x16xf32>
    %78 = tpu.concatenate %76, %77 in 0 : vector<8x16xf32>, vector<8x16xf32> -> vector<16x16xf32>
    "tpu.trace_start"() <{level = 10 : i32, message = "hqd,hdk->hqk"}> : () -> ()
    %cst_24 = arith.constant dense<0.000000e+00> : vector<4x16x16xf32>
    %79 = tpu.matmul %50, %59, %cst_24 {dimension_numbers = #tpu.dot_dimension_numbers<[2], [1], [1], [2], [0, 0, 0, 1, 1, 2], [0], [0]>} : vector<4x16x8xf32>, vector<4x8x16xf32>, vector<4x16x16xf32> -> vector<4x16x16xf32>
    "tpu.trace_stop"() : () -> ()
    %80 = vector.shape_cast %78 : vector<16x16xf32> to vector<1x16x16xf32>
    %81 = vector.broadcast %80 : vector<1x16x16xf32> to vector<4x16x16xf32>
    %82 = arith.addf %79, %81 : vector<4x16x16xf32>
    %cst_25 = arith.constant dense<0xFF800000> : vector<4x16xf32>
    %83 = vector.multi_reduction <maximumf>, %82, %cst_25 [2] : vector<4x16x16xf32> to vector<4x16xf32>
    %84 = vector.shape_cast %83 : vector<4x16xf32> to vector<4x16x1xf32>
    %85 = vector.broadcast %84 : vector<4x16x1xf32> to vector<4x16x16xf32>
    %86 = arith.subf %82, %85 : vector<4x16x16xf32>
    %87 = math.exp %86 : vector<4x16x16xf32>
    %cst_26 = arith.constant dense<0.000000e+00> : vector<4x16xf32>
    %88 = vector.multi_reduction <add>, %87, %cst_26 [2] : vector<4x16x16xf32> to vector<4x16xf32>
    %89 = vector.shape_cast %88 : vector<4x16xf32> to vector<4x16x1xf32>
    %90 = vector.broadcast %89 : vector<4x16x1xf32> to vector<4x16x16xf32>
    %91 = arith.divf %87, %90 : vector<4x16x16xf32>
    "tpu.trace_start"() <{level = 10 : i32, message = "hqk,hkd->hqd"}> : () -> ()
    %cst_27 = arith.constant dense<0.000000e+00> : vector<4x16x8xf32>
    %92 = tpu.matmul %91, %68, %cst_27 {dimension_numbers = #tpu.dot_dimension_numbers<[2], [1], [1], [2], [0, 0, 0, 1, 1, 2], [0], [0]>} : vector<4x16x16xf32>, vector<4x16x8xf32>, vector<4x16x8xf32> -> vector<4x16x8xf32>
    "tpu.trace_stop"() : () -> ()
    %93 = vector.extract_strided_slice %92 {offsets = [0, 0, 0], sizes = [1, 16, 8], strides = [1, 1, 1]} : vector<4x16x8xf32> to vector<1x16x8xf32>
    %94 = vector.shape_cast %93 : vector<1x16x8xf32> to vector<16x8xf32>
    %95 = vector.extract_strided_slice %92 {offsets = [1, 0, 0], sizes = [1, 16, 8], strides = [1, 1, 1]} : vector<4x16x8xf32> to vector<1x16x8xf32>
    %96 = vector.shape_cast %95 : vector<1x16x8xf32> to vector<16x8xf32>
    %97 = vector.extract_strided_slice %92 {offsets = [2, 0, 0], sizes = [1, 16, 8], strides = [1, 1, 1]} : vector<4x16x8xf32> to vector<1x16x8xf32>
    %98 = vector.shape_cast %97 : vector<1x16x8xf32> to vector<16x8xf32>
    %99 = vector.extract_strided_slice %92 {offsets = [3, 0, 0], sizes = [1, 16, 8], strides = [1, 1, 1]} : vector<4x16x8xf32> to vector<1x16x8xf32>
    %100 = vector.shape_cast %99 : vector<1x16x8xf32> to vector<16x8xf32>
    %101 = tpu.concatenate %94, %96, %98, %100 in 1 : vector<16x8xf32>, vector<16x8xf32>, vector<16x8xf32>, vector<16x8xf32> -> vector<16x32xf32>
    %cst_28 = arith.constant dense<0.000000e+00> : vector<16x32xf32>
    %102 = tpu.matmul %101, %10, %cst_28 {dimension_numbers = #tpu.dot_dimension_numbers<[1], [0], [0], [1], [0, 0, 1, 1], [], []>} : vector<16x32xf32>, vector<32x32xf32>, vector<16x32xf32> -> vector<16x32xf32>
    %103 = vector.broadcast %6 : vector<1x32xf32> to vector<16x32xf32>
    %104 = arith.addf %102, %103 : vector<16x32xf32>
    %105 = arith.addf %0, %104 : vector<16x32xf32>
    %cst_29 = arith.constant dense<0.000000e+00> : vector<16xf32>
    %106 = vector.multi_reduction <add>, %105, %cst_29 [1] : vector<16x32xf32> to vector<16xf32>
    %107 = vector.shape_cast %106 : vector<16xf32> to vector<16x1xf32>
    %cst_30 = arith.constant 3.200000e+01 : f32
    %108 = vector.broadcast %cst_30 : f32 to vector<16x1xf32>
    %109 = arith.divf %107, %108 : vector<16x1xf32>
    %110 = vector.broadcast %109 : vector<16x1xf32> to vector<16x32xf32>
    %111 = arith.subf %105, %110 : vector<16x32xf32>
    %112 = arith.mulf %111, %111 : vector<16x32xf32>
    %cst_31 = arith.constant dense<0.000000e+00> : vector<16xf32>
    %113 = vector.multi_reduction <add>, %112, %cst_31 [1] : vector<16x32xf32> to vector<16xf32>
    %114 = vector.shape_cast %113 : vector<16xf32> to vector<16x1xf32>
    %cst_32 = arith.constant 3.200000e+01 : f32
    %115 = vector.broadcast %cst_32 : f32 to vector<16x1xf32>
    %116 = arith.divf %114, %115 : vector<16x1xf32>
    %117 = vector.broadcast %109 : vector<16x1xf32> to vector<16x32xf32>
    %118 = arith.subf %105, %117 : vector<16x32xf32>
    %cst_33 = arith.constant 9.99999974E-6 : f32
    %119 = vector.broadcast %cst_33 : f32 to vector<16x1xf32>
    %120 = arith.addf %116, %119 : vector<16x1xf32>
    %121 = math.rsqrt %120 : vector<16x1xf32>
    %122 = vector.broadcast %121 : vector<16x1xf32> to vector<16x32xf32>
    %123 = arith.mulf %118, %122 : vector<16x32xf32>
    %124 = vector.broadcast %3 : vector<1x32xf32> to vector<16x32xf32>
    %125 = arith.mulf %123, %124 : vector<16x32xf32>
    %126 = vector.broadcast %4 : vector<1x32xf32> to vector<16x32xf32>
    %127 = arith.addf %125, %126 : vector<16x32xf32>
    %cst_34 = arith.constant dense<0.000000e+00> : vector<16x128xf32>
    %128 = tpu.matmul %127, %11, %cst_34 {dimension_numbers = #tpu.dot_dimension_numbers<[1], [0], [0], [1], [0, 0, 1, 1], [], []>} : vector<16x32xf32>, vector<32x128xf32>, vector<16x128xf32> -> vector<16x128xf32>
    %129 = vector.broadcast %7 : vector<1x128xf32> to vector<16x128xf32>
    %130 = arith.addf %128, %129 : vector<16x128xf32>
    %cst_35 = arith.constant 5.000000e-01 : f32
    %131 = vector.broadcast %cst_35 : f32 to vector<16x128xf32>
    %132 = arith.mulf %131, %130 : vector<16x128xf32>
    %cst_36 = arith.constant 4.471500e-02 : f32
    %133 = vector.broadcast %cst_36 : f32 to vector<16x128xf32>
    %134 = arith.mulf %133, %130 : vector<16x128xf32>
    %135 = arith.mulf %134, %130 : vector<16x128xf32>
    %136 = arith.mulf %135, %130 : vector<16x128xf32>
    %137 = arith.addf %130, %136 : vector<16x128xf32>
    %cst_37 = arith.constant 0.797884583 : f32
    %138 = vector.broadcast %cst_37 : f32 to vector<16x128xf32>
    %139 = arith.mulf %138, %137 : vector<16x128xf32>
    %140 = math.tanh %139 : vector<16x128xf32>
    %cst_38 = arith.constant 1.000000e+00 : f32
    %141 = vector.broadcast %cst_38 : f32 to vector<16x128xf32>
    %142 = arith.addf %141, %140 : vector<16x128xf32>
    %143 = arith.mulf %132, %142 : vector<16x128xf32>
    %cst_39 = arith.constant dense<0.000000e+00> : vector<16x32xf32>
    %144 = tpu.matmul %143, %12, %cst_39 {dimension_numbers = #tpu.dot_dimension_numbers<[1], [0], [0], [1], [0, 0, 1, 1], [], []>} : vector<16x128xf32>, vector<128x32xf32>, vector<16x32xf32> -> vector<16x32xf32>
    %145 = vector.broadcast %8 : vector<1x32xf32> to vector<16x32xf32>
    %146 = arith.addf %144, %145 : vector<16x32xf32>
    %147 = arith.addf %105, %146 : vector<16x32xf32>
    %c0_40 = arith.constant 0 : index
    %c0_41 = arith.constant 0 : index
    %148 = vector.load %arg4[%c0_40, %c0_41] : memref<16x32xf32, #tpu.memory_space<vmem>>, vector<16x32xf32>
    tpu.vector_store %arg4[%c0_40, %c0_41], %147 {strides = array<i32>} : memref<16x32xf32, #tpu.memory_space<vmem>>, vector<16x32xf32>,
    return
  }
}

</mosaic_0001>

<bundles_post_ra>
// kernel: tpu_custom_call.1
= control target key start
LH: loop header
LB: loop body
LE: loop exit
PB: predicated region body
PF: predicated region fallthrough
CT: control target
= control target key end

     0   :  { %vm52_vm0 = vcmask 261120   ;;  %s2070_s0 = inlined_call_operand.vmem [shape: f32[16,32], index: 0, kind: input, shape index: {}]   ;;  %s2071_s1 = inlined_call_operand.vmem [shape: f32[8,128], index: 1, kind: input, shape index: {}]   ;;  %s2072_s2 = inlined_call_operand.vmem [shape: f32[32,256], index: 2, kind: input, shape index: {}]   ;;  %s2073_s3 = inlined_call_operand.vmem [shape: f32[128,32], index: 3, kind: input, shape index: {}]   ;;  %s2074_s4 = inlined_call_operand.hbm [shape: f32[16,32], index: 4, kind: output, shape index: {}]  }
   0x1   :  { %v1802_v0 = vld [vmem:[%s2070_s0] sm:$0xff]  ;;  %v1807_v1 = vld [vmem:[%s2070_s0 + $0x8] sm:$0xff] }
   0x2   :  { %9 = vsyncpa [#allocation3], 0  ;;  %v53_v2 = vsel %vm52_vm0, %v1802_v0, 0.0  ;;  %v56_v3 = vsel %vm52_vm0, %v1807_v1, 0.0  ;;  %v1820_v14 = vld [vmem:[%s2072_s2] sm:$0xff]  ;;  %v1825_v15 = vld [vmem:[%s2072_s2 + $0x10] sm:$0xff]  ;;  %v229_v45 = vlaneseq }
   0x3   :  { %54 = vadd.xlane.f32.xlu0 %v53_v2  ;;  %v1830_v16 = vld [vmem:[%s2072_s2 + $0x20] sm:$0xff]  ;;  %v1684_v17 = vpack.i.bf16 %v1825_v15, %v1820_v14  ;;  %v1579_v18 = vpack.c.bf16 %v1825_v15, %v1820_v14  ;;  %v1839_v19 = vld [vmem:[%s2072_s2 + $0x30] sm:$0xff]  ;;  %vm235_vm1 = vcmask 64512   ;;  %s1762_s6 = smov 96   ;;  %s1763_s7 = smov 120   ;;  %vm558_vm3 = vcmask 130048  }
   0x4   :  { %v1583_v20 = vpack.c.bf16 %v1839_v19, %v1830_v16  ;;  %v1369_v28 = vld [vmem:[%s2071_s1] ss:$0 sm:$0xff]  ;;  %v1370_v30 = vld [vmem:[%s2071_s1 + $0x1] ss:$0 sm:$0xff]  ;;  %v1371_v37 = vld [vmem:[%s2071_s1 + $0x4] ss:$0 sm:$0xff] }
   0x5   :  { %1580 = vmatprep.subr.bf16.mxu0 %v1579_v18  ;;  %s1764_s8 = smov 112   ;;  %s1765_s9 = smov 104   ;;  %v230_v46 = vshrl.u32 %v229_v45, 7  ;;  %v232_v47 = vand.u32 127, %v229_v45  ;;  %v1766_v48 = vmov -1e+30  }
   0x6   :  { %1582 = vmatpush3.bf16.msra.mxu0 %v1579_v18  ;;  %s1767_s10 = smov 8   ;;  %s1768_s11 = smov 64   ;;  %vm1023_vm4 = vcmask 195584  }
   0x7   :  { %57 = vadd.xlane.f32.xlu0 %v56_v3  ;;  %1584 = vmatprep.subr.bf16.mxu0 %v1583_v20  ;;  %vm233_vm2 = vcmp.le.s32.totalorder %v232_v47, %v230_v46  ;;  %s1769_s12 = smov 32   ;;  %s1770_s13 = smov 16  }
   0x8   :  { %v234_v49 = vsel %vm233_vm2, 0.0, %v1766_v48  ;;  %s1771_s14 = smov 24  }
   0x9   :  { %v236_v61 = vsel %vm235_vm1, %v234_v49, -1e+30 }
   0xa   :  { %1586 = vmatpush3.bf16.msra.mxu0 %v1583_v20 }
  0x90   :  { %v55_v4 = vpop.xlane.xlu0 %54 }
  0x91   :  { %v60_v5 = vmul.f32 0.03125, %v55_v4 }
  0x93   :  { %v62_v6 = vsub.f32 %v1802_v0, %v60_v5 }
  0x94   :  { %v58_v7 = vpop.xlane.xlu0 %57 }
  0x95   :  { %v61_v8 = vmul.f32 0.03125, %v58_v7  ;;  %v64_v9 = vmul.f32 %v62_v6, %v62_v6 }
  0x97   :  { %v63_v10 = vsub.f32 %v1807_v1, %v61_v8  ;;  %v66_v11 = vsel %vm52_vm0, %v64_v9, 0.0 }
  0x98   :  { %67 = vadd.xlane.f32.xlu1 %v66_v11 }
  0x99   :  { %v65_v12 = vmul.f32 %v63_v10, %v63_v10 }
  0x9b   :  { %v69_v13 = vsel %vm52_vm0, %v65_v12, 0.0 }
  0x9c   :  { %70 = vadd.xlane.f32.xlu1 %v69_v13 }
 0x125   :  { %v68_v21 = vpop.xlane.xlu1 %67 }
 0x126   :  { %v72_v22 = vmul.f32 0.03125, %v68_v21 }
 0x128   :  { %v74_v23 = vadd.f32 1e-05, %v72_v22 }
 0x129   :  { %v71_v24 = vpop.xlane.xlu1 %70 }
 0x12a   :  { %1694 = vrsqrt.f32 %v74_v23  ;;  %v73_v25 = vmul.f32 0.03125, %v71_v24 }
 0x12c   :  { %v75_v26 = vadd.f32 1e-05, %v73_v25 }
 0x12e   :  { %1696 = vrsqrt.f32 %v75_v26 }
 0x134   :  { %v1695_v27 = vpop.eup %1694 }
 0x135   :  { %v78_v29 = vmul.f32 %v1695_v27, %v62_v6 }
 0x137   :  { %v84_v31 = vmul.f32 %v1369_v28, %v78_v29 }
 0x138   :  { %v1697_v32 = vpop.eup %1696 }
 0x139   :  { %v79_v33 = vmul.f32 %v1697_v32, %v63_v10  ;;  %v90_v34 = vadd.f32 %v1370_v30, %v84_v31 }
 0x13b   :  { %v85_v35 = vmul.f32 %v1369_v28, %v79_v33  ;;  %1471 = vmatprep.mubr.msk.f32.mxu0 %vm52_vm0, %v90_v34 }
 0x13d   :  { %v91_v36 = vadd.f32 %v1370_v30, %v85_v35 }
 0x13f   :  { %1472 = vmatmul.mubr.msk.f32.vlgmr.msra.gmra.mrb[0].mxu0 %vm52_vm0, %v91_v36 }
 0x212   :  { %v1473_v38 = vpop.f32.mrb[0].mxu0 }
 0x213   :  { %v1854_v39 = vadd.f32 %v1473_v38, %v1371_v37  ;;  %v168_v40 = vpop.f32.mrb[1].mxu0 }
 0x214   :  { %v1856_v41 = vadd.f32 %v1371_v37, %v168_v40 }
 0x215   :  { %181 = vrot.lane.b32.xlu1 %v1854_v39, %s1762_s6 }
 0x216   :  { %179 = vrot.lane.b32.xlu0 %v1856_v41, %s1762_s6  ;;  %1476 = vmatprep.mubr.msk.f32.mxu0 %vm235_vm1, %v1856_v41  ;;  %v1664_v29 = vpack.i.bf16 %v1854_v39, %v1856_v41 }
 0x219   :  { %219 = vrot.lane.b32.xlu1 %v1854_v39, %s1763_s7 }
 0x21a   :  { %221 = vrot.lane.b32.xlu0 %v1856_v41, %s1764_s8 }
 0x21d   :  { %217 = vrot.lane.b32.xlu1 %v1856_v41, %s1763_s7 }
 0x21e   :  { %225 = vrot.lane.b32.xlu0 %v1856_v41, %s1765_s9 }
 0x221   :  { %223 = vrot.lane.b32.xlu1 %v1854_v39, %s1764_s8 }
 0x225   :  { %227 = vrot.lane.b32.xlu1 %v1854_v39, %s1765_s9  ;;  %s1772_s9 = smov [#allocation2]  }
 0x229   :  { %238 = vrot.lane.b32.xlu1 %v234_v49, %s1767_s10 }
 0x287   :  { %v182_v43 = vpop.permute.xlu1 %181 }
 0x288   :  { %v180_v42 = vpop.permute.xlu0 %179 }
 0x289   :  { %185 = vxpose.xlu0.b32.start [1/2] (short) (narrow) %v180_v42, 32 }
 0x28b   :  { %v1873_v50 = vpop.permute.xlu1 %219 }
 0x28c   :  { %v1868_v44 = vpop.permute.xlu0 %221 }
 0x28d   :  { %186 = vxpose.xlu0.b32.end [2/2] (short) (narrow) %v182_v43, 32  ;;  %1486 = vmatprep.mubr.msk.f32.mxu1 %vm235_vm1, %v1868_v44 }
 0x28f   :  { %v1877_v53 = vpop.permute.xlu1 %217 }
 0x290   :  { %v1875_v51 = vpop.permute.xlu0 %225 }
 0x293   :  { %v1885_v55 = vpop.permute.xlu1 %223 }
 0x297   :  { %v1891_v58 = vpop.permute.xlu1 %227 }
 0x29b   :  { %v239_v59 = vpop.permute.xlu1 %238 }
 0x29c   :  { %v241_v60 = vsel %vm235_vm1, -1e+30, %v239_v59 }
 0x309   :  { %v201_v52 = vpop.trf.xlu0 }
 0x30a   :  { %1474 = vmatprep.subr.mxu0 %v201_v52 }
 0x30b   :  { %1475 = vmatpush3.msra.mxu0 %v201_v52 }
 0x30c   :  { %1477 = vmatmul.mubr.msk.f32.vlgmr.msra.gmra.mrb[2].mxu0 %vm235_vm1, %v1854_v39 }
 0x30d   :  { %v202_v54 = vpop.trf.xlu0  ;;  %1481 = vmatprep.mubr.msk.f32.mxu0 %vm235_vm1, %v1877_v53 }
 0x30e   :  { %1479 = vmatprep.subr.mxu0 %v202_v54 }
 0x30f   :  { %1480 = vmatpush3.msra.mxu0 %v202_v54 }
 0x310   :  { %1482 = vmatmul.mubr.msk.f32.vlgmr.msra.gmra.mrb[4].mxu0 %vm235_vm1, %v1873_v50 }
 0x311   :  { %v203_v56 = vpop.trf.xlu0  ;;  %1491 = vmatprep.mubr.msk.f32.mxu0 %vm235_vm1, %v1875_v51 }
 0x312   :  { %1484 = vmatprep.subr.mxu1 %v203_v56 }
 0x313   :  { %1485 = vmatpush3.msra.mxu1 %v203_v56 }
 0x314   :  { %1487 = vmatmul.mubr.msk.f32.vlgmr.msra.gmra.mrb[0].mxu1 %vm235_vm1, %v1885_v55 }
 0x315   :  { %v204_v57 = vpop.trf.xlu0 }
 0x316   :  { %1489 = vmatprep.subr.mxu0 %v204_v57 }
 0x317   :  { %1490 = vmatpush3.msra.mxu0 %v204_v57 }
 0x318   :  { %1492 = vmatmul.mubr.msk.f32.vlgmr.msra.gmra.mrb[6].mxu0 %vm235_vm1, %v1891_v58 }
 0x3df   :  { %v1478_v62 = vpop.f32.mrb[2].mxu0 }
 0x3e0   :  { %v318_v63 = vadd.f32 %v1478_v62, %v241_v60  ;;  %v312_v2 = vpop.f32.mrb[3].mxu0 }
 0x3e1   :  { %v313_v3 = vadd.f32 %v312_v2, %v236_v61 }
 0x3e2   :  { %v562_v4 = vsel %vm558_vm3, %v318_v63, -inf }
 0x3e3   :  { %563 = vmax.xlane.f32.xlu0 %v562_v4  ;;  %v1483_v5 = vpop.f32.mrb[4].mxu0  ;;  %v559_v6 = vsel %vm558_vm3, %v313_v3, -inf }
 0x3e4   :  { %v397_v7 = vadd.f32 %v1483_v5, %v241_v60  ;;  %v391_v8 = vpop.f32.mrb[5].mxu0  ;;  %560 = vmax.xlane.f32.xlu1 %v559_v6 }
 0x3e5   :  { %v392_v9 = vadd.f32 %v391_v8, %v236_v61 }
 0x3e6   :  { %v568_v10 = vsel %vm558_vm3, %v397_v7, -inf }
 0x3e7   :  { %v1488_v11 = vpop.f32.mrb[0].mxu1  ;;  %v565_v21 = vsel %vm558_vm3, %v392_v9, -inf }
 0x3e8   :  { %v470_v12 = vpop.f32.mrb[1].mxu1  ;;  %569 = vmax.xlane.f32.xlu1 %v568_v10  ;;  %v476_v18 = vadd.f32 %v1488_v11, %v241_v60 }
 0x3e9   :  { %v471_v13 = vadd.f32 %v470_v12, %v236_v61 }
 0x3ea   :  { %v574_v24 = vsel %vm558_vm3, %v476_v18, -inf }
 0x3eb   :  { %v1493_v20 = vpop.f32.mrb[6].mxu0  ;;  %v571_v26 = vsel %vm558_vm3, %v471_v13, -inf }
 0x3ec   :  { %v549_v22 = vpop.f32.mrb[7].mxu0  ;;  %566 = vmax.xlane.f32.xlu1 %v565_v21  ;;  %v555_v25 = vadd.f32 %v1493_v20, %v241_v60  ;;  %v1669_v20 = vpack.i.bf16 %v1873_v50, %v1877_v53 }
 0x3ed   :  { %v1901_v23 = vadd.f32 %v549_v22, %v236_v61 }
 0x3ee   :  { %v580_v27 = vsel %vm558_vm3, %v555_v25, -inf }
 0x3ef   :  { %v577_v28 = vsel %vm558_vm3, %v1901_v23, -inf }
 0x3f0   :  { %575 = vmax.xlane.f32.xlu1 %v574_v24 }
 0x3f4   :  { %572 = vmax.xlane.f32.xlu1 %v571_v26  ;;  %v1679_v26 = vpack.i.bf16 %v1891_v58, %v1875_v51 }
 0x3f8   :  { %581 = vmax.xlane.f32.xlu1 %v580_v27 }
 0x3fc   :  { %578 = vmax.xlane.f32.xlu1 %v577_v28 }
 0x40d   :  { %1665 = vrot.lane.b32.xlu1 %v1664_v29, %s1768_s11 }
 0x470   :  { %v564_v30 = vpop.xlane.xlu0 %563 }
 0x471   :  { %v584_v31 = vsub.f32 %v318_v63, %v564_v30  ;;  %v561_v32 = vpop.xlane.xlu1 %560 }
 0x472   :  { %v583_v33 = vsub.f32 %v313_v3, %v561_v32 }
 0x473   :  { %v593_v34 = vmul.f32 1.442695, %v584_v31 }
 0x474   :  { %v591_v35 = vmul.f32 1.442695, %v583_v33 }
 0x475   :  { %1698 = vpow2.f32 %v593_v34  ;;  %v570_v36 = vpop.xlane.xlu1 %569 }
 0x476   :  { %v586_v37 = vsub.f32 %v397_v7, %v570_v36  ;;  %1700 = vpow2.f32 %v591_v35 }
 0x478   :  { %v597_v38 = vmul.f32 1.442695, %v586_v37 }
 0x479   :  { %v567_v40 = vpop.xlane.xlu1 %566 }
 0x47a   :  { %v585_v42 = vsub.f32 %v392_v9, %v567_v40  ;;  %1702 = vpow2.f32 %v597_v38 }
 0x47c   :  { %v595_v43 = vmul.f32 1.442695, %v585_v42 }
 0x47d   :  { %v576_v45 = vpop.xlane.xlu1 %575 }
 0x47e   :  { %v588_v39 = vsub.f32 %v476_v18, %v576_v45  ;;  %1704 = vpow2.f32 %v595_v43  ;;  %v1674_v18 = vpack.i.bf16 %v1885_v55, %v1868_v44 }
 0x47f   :  { %v1699_v41 = vpop.eup %1698 }
 0x480   :  { %v601_v46 = vmul.f32 1.442695, %v588_v39  ;;  %v610_v47 = vsel %vm558_vm3, %v1699_v41, 0.0  ;;  %v1701_v48 = vpop.eup %1700 }
 0x481   :  { %611 = vadd.xlane.f32.xlu1 %v610_v47  ;;  %v573_v49 = vpop.xlane.xlu1 %572  ;;  %v607_v56 = vsel %vm558_vm3, %v1701_v48, 0.0 }
 0x482   :  { %1706 = vpow2.f32 %v601_v46  ;;  %v587_v52 = vsub.f32 %v471_v13, %v573_v49 }
 0x484   :  { %v599_v54 = vmul.f32 1.442695, %v587_v52  ;;  %v1913_v57 = vpop.eup %1702 }
 0x485   :  { %608 = vadd.xlane.f32.xlu1 %v607_v56  ;;  %v582_v59 = vpop.xlane.xlu1 %581  ;;  %v616_v62 = vsel %vm558_vm3, %v1913_v57, 0.0 }
 0x486   :  { %1708 = vpow2.f32 %v599_v54  ;;  %v590_v60 = vsub.f32 %v555_v25, %v582_v59 }
 0x488   :  { %v605_v61 = vmul.f32 1.442695, %v590_v60  ;;  %v1705_v63 = vpop.eup %1704 }
 0x489   :  { %617 = vadd.xlane.f32.xlu1 %v616_v62  ;;  %v579_v2 = vpop.xlane.xlu1 %578  ;;  %v613_v4 = vsel %vm558_vm3, %v1705_v63, 0.0 }
 0x48a   :  { %1710 = vpow2.f32 %v605_v61  ;;  %v589_v21 = vsub.f32 %v1901_v23, %v579_v2 }
 0x48c   :  { %v1917_v3 = vpop.eup %1706  ;;  %v603_v22 = vmul.f32 1.442695, %v589_v21 }
 0x48d   :  { %614 = vadd.xlane.f32.xlu1 %v613_v4  ;;  %v1666_v5 = vpop.permute.xlu1 %1665  ;;  %v622_v6 = vsel %vm558_vm3, %v1917_v3, 0.0 }
 0x48e   :  { %v1668_v7 = vunpack.i.h.bf16 %v1666_v5  ;;  %v1667_v8 = vunpack.i.l.bf16 %v1666_v5  ;;  %623 = vadd.xlane.f32.xlu0 %v622_v6  ;;  %1712 = vpow2.f32 %v603_v22 }
 0x490   :  { %v1709_v9 = vpop.eup %1708  ;;  %v1587_v10 = vpack.c.bf16 %v1668_v7, %v1667_v8 }
 0x491   :  { %v619_v11 = vsel %vm558_vm3, %v1709_v9, 0.0 }
 0x492   :  { %620 = vadd.xlane.f32.xlu1 %v619_v11  ;;  %1588 = vmatprep.subr.bf16.mxu1 %v1587_v10 }
 0x493   :  { %1590 = vmatpush3.bf16.msra.mxu1 %v1587_v10 }
 0x494   :  { %v1923_v12 = vpop.eup %1710 }
 0x495   :  { %v628_v13 = vsel %vm558_vm3, %v1923_v12, 0.0 }
 0x496   :  { %629 = vadd.xlane.f32.xlu0 %v628_v13 }
 0x498   :  { %v1713_v24 = vpop.eup %1712 }
 0x499   :  { %v625_v25 = vsel %vm558_vm3, %v1713_v24, 0.0 }
 0x4a3   :  { %1675 = vrot.lane.b32.xlu1 %v1674_v18, %s1768_s11 }
 0x4ac   :  { %1670 = vrot.lane.b32.xlu0 %v1669_v20, %s1768_s11 }
 0x4c7   :  { %626 = vadd.xlane.f32.xlu1 %v625_v25 }
 0x4d8   :  { %1680 = vrot.lane.b32.xlu1 %v1679_v26, %s1768_s11  ;;  %s1358_s11 = sshll.u32 %s1772_s9, 4  ;;  %s1359_s11 = int_to_ptr.vmem [resolvable:$true] %s1358_s11 }
 0x4d9   :  { %p1743_p1 = scmp.lt.s32.totalorder %s1359_s11, %s1359_s11 }
 0x4dc   :  { %1685 = vrot.lane.b32.xlu1 %v1684_v17, %s1769_s12 }
 0x50e   :  { %v612_v44 = vpop.xlane.xlu1 %611 }
 0x50f   :  { %1714 = vrcp.f32 %v612_v44 }
 0x512   :  { %v609_v55 = vpop.xlane.xlu1 %608 }
 0x513   :  { %1716 = vrcp.f32 %v609_v55 }
 0x516   :  { %v618_v50 = vpop.xlane.xlu1 %617 }
 0x519   :  { %v1715_v27 = vpop.eup %1714 }
 0x51a   :  { %v615_v53 = vpop.xlane.xlu1 %614  ;;  %v634_v30 = vmul.f32 %v1715_v27, %v1699_v41 }
 0x51b   :  { %1718 = vrcp.f32 %v615_v53  ;;  %v624_v23 = vpop.xlane.xlu0 %623  ;;  %v1390_v53 = vld [vmem:[%s2071_s1 + $0x5] ss:$0 sm:$0xff] }
 0x51c   :  { %1720 = vrcp.f32 %v624_v23 }
 0x51d   :  { %v1717_v28 = vpop.eup %1716 }
 0x51e   :  { %v632_v29 = vmul.f32 %v1717_v28, %v1701_v48 }
 0x51f   :  { %v621_v31 = vpop.xlane.xlu1 %620 }
 0x520   :  { %1722 = vrcp.f32 %v621_v31  ;;  %1498 = vmatprep.mubr.msk.f32.mxu1 %vm558_vm3, %v632_v29 }
 0x521   :  { %1724 = vrcp.f32 %v618_v50  ;;  %1499 = vmatmul.mubr.msk.f32.vlgmr.msra.gmra.mrb[2].mxu1 %vm558_vm3, %v634_v30 }
 0x523   :  { %v630_v51 = vpop.xlane.xlu0 %629  ;;  %v1676_v58 = vpop.permute.xlu1 %1675 }
 0x524   :  { %v1678_v32 = vunpack.i.h.bf16 %v1676_v58  ;;  %v1677_v33 = vunpack.i.l.bf16 %v1676_v58  ;;  %1726 = vrcp.f32 %v630_v51 }
 0x525   :  { %v1719_v34 = vpop.eup %1718 }
 0x526   :  { %v1595_v35 = vpack.c.bf16 %v1678_v32, %v1677_v33  ;;  %v636_v36 = vmul.f32 %v1719_v34, %v1705_v63  ;;  %v1721_v42 = vpop.eup %1720 }
 0x527   :  { %v1671_v37 = vpop.permute.xlu0 %1670  ;;  %v642_v46 = vmul.f32 %v1721_v42, %v1917_v3  ;;  %v32_v42 = vld [vmem:[%s2072_s2 + $0x8] sm:$0xff] }
 0x528   :  { %v1673_v38 = vunpack.i.h.bf16 %v1671_v37  ;;  %v1672_v40 = vunpack.i.l.bf16 %v1671_v37  ;;  %1505 = vmatprep.mubr.msk.f32.mxu0 %vm558_vm3, %v636_v36  ;;  %1596 = vmatprep.subr.bf16.mxu1 %v1595_v35 }
 0x529   :  { %1598 = vmatpush3.bf16.msra.mxu1 %v1595_v35 }
 0x52a   :  { %v1723_v43 = vpop.eup %1722  ;;  %v1591_v45 = vpack.c.bf16 %v1673_v38, %v1672_v40 }
 0x52b   :  { %v1725_v39 = vpop.eup %1724  ;;  %v640_v41 = vmul.f32 %v1723_v43, %v1709_v9  ;;  %v33_v43 = vld [vmem:[%s2072_s2 + $0x18] sm:$0xff] }
 0x52c   :  { %1592 = vmatprep.subr.bf16.mxu0 %v1591_v45  ;;  %v638_v47 = vmul.f32 %v1725_v39, %v1913_v57  ;;  %v1689_v57 = vpack.i.bf16 %v1839_v19, %v1830_v16  ;;  %v34_v39 = vld [vmem:[%s2072_s2 + $0x28] sm:$0xff] }
 0x52d   :  { %1594 = vmatpush3.bf16.msra.mxu0 %v1591_v45  ;;  %1512 = vmatprep.mubr.msk.f32.mxu1 %vm558_vm3, %v640_v41  ;;  %v1611_v45 = vpack.c.bf16 %v33_v43, %v32_v42  ;;  %v35_v41 = vld [vmem:[%s2072_s2 + $0x38] sm:$0xff] }
 0x52e   :  { %1513 = vmatmul.mubr.msk.f32.vlgmr.msra.gmra.mrb[4].mxu1 %vm558_vm3, %v642_v46  ;;  %v1727_v59 = vpop.eup %1726  ;;  %1690 = vrot.lane.b32.xlu0 %v1689_v57, %s1769_s12  ;;  %v1615_v46 = vpack.c.bf16 %v35_v41, %v34_v39  ;;  %v1393_v57 = vld [vmem:[%s2071_s1 + $0x2] ss:$0 sm:$0xff]  ;;  %s1738_s12 = scalar_lea.vmem %s1359_s11, 256 }
 0x52f   :  { %v646_v62 = vmul.f32 %v1727_v59, %v1923_v12  ;;  %p1739_p0 = scmp.ne.s32.totalorder %s1359_s11, %s1738_s12  ;;  %p1744_p2 = scmp.lt.s32.totalorder %s1738_s12, %s1738_s12 }
 0x530   :  { %1506 = vmatmul.mubr.msk.f32.vlgmr.msra.gmra.mrb[8].mxu0 %vm558_vm3, %v638_v47  ;;  %v36_v47 = vld [vmem:[%s2073_s3] sm:$0xff] }
 0x531   :  { %p1745_p3 = por %p1744_p2, %p1743_p1 }
 0x533   :  { %p1746_p4 = pnand %p1745_p3, %p1739_p0 }
 0x554   :  { %v627_v48 = vpop.xlane.xlu1 %626 }
 0x555   :  { %1728 = vrcp.f32 %v627_v48  ;;  %v37_v48 = vld [vmem:[%s2073_s3 + $0x8] sm:$0xff] }
 0x558   :  { %v1681_v49 = vpop.permute.xlu1 %1680 }
 0x559   :  { %v1683_v52 = vunpack.i.h.bf16 %v1681_v49  ;;  %v1682_v54 = vunpack.i.l.bf16 %v1681_v49  ;;  %v1619_v49 = vpack.c.bf16 %v37_v48, %v36_v47  ;;  %v1398_v48 = vld [vmem:[%s2071_s1 + $0x7] ss:$0 sm:$0xff] }
 0x55b   :  { %v1599_v56 = vpack.c.bf16 %v1683_v52, %v1682_v54  ;;  %1620 = vmatprep.subr.bf16.mxu1 %v1619_v49 }
 0x55c   :  { %v1686_v63 = vpop.permute.xlu1 %1685  ;;  %1622 = vmatpush3.bf16.msra.mxu1 %v1619_v49 }
 0x55d   :  { %1600 = vmatprep.subr.bf16.mxu0 %v1599_v56  ;;  %v1688_v3 = vunpack.i.h.bf16 %v1686_v63  ;;  %v1687_v4 = vunpack.i.l.bf16 %v1686_v63 }
 0x55e   :  { %1602 = vmatpush3.bf16.msra.mxu0 %v1599_v56 }
 0x55f   :  { %v1729_v60 = vpop.eup %1728  ;;  %v1603_v7 = vpack.c.bf16 %v1688_v3, %v1687_v4 }
 0x560   :  { %v644_v61 = vmul.f32 %v1729_v60, %v1713_v24 }
 0x561   :  { %1604 = vmatprep.subr.bf16.mxu0 %v1603_v7 }
 0x562   :  { %1519 = vmatprep.mubr.msk.f32.mxu0 %vm558_vm3, %v644_v61 }
 0x563   :  { %1520 = vmatmul.mubr.msk.f32.vlgmr.msra.gmra.mrb[10].mxu0 %vm558_vm3, %v646_v62 }
 0x564   :  { %1606 = vmatpush3.bf16.msra.mxu0 %v1603_v7 }
 0x5a0   :  { %v1691_v2 = vpop.permute.xlu0 %1690 }
 0x5a1   :  { %v1693_v5 = vunpack.i.h.bf16 %v1691_v2  ;;  %v1692_v6 = vunpack.i.l.bf16 %v1691_v2  ;;  %v1394_v2 = vld [vmem:[%s2071_s1 + $0x3] ss:$0 sm:$0xff] }
 0x5a3   :  { %v1607_v8 = vpack.c.bf16 %v1693_v5, %v1692_v6 }
 0x5a5   :  { %1608 = vmatprep.subr.bf16.mxu0 %v1607_v8 }
 0x5a6   :  { %1610 = vmatpush3.bf16.msra.mxu0 %v1607_v8 }
 0x5a7   :  { %1612 = vmatprep.subr.bf16.mxu0 %v1611_v45 }
 0x5f4   :  { %v1500_v9 = vpop.f32.mrb[2].mxu1 }
 0x5f5   :  { %v725_v16 = vpop.f32.mrb[3].mxu1 }
 0x601   :  { %v1514_v19 = vpop.f32.mrb[4].mxu1 }
 0x602   :  { %v899_v10 = vpop.f32.mrb[5].mxu1 }
 0x603   :  { %v1507_v11 = vpop.f32.mrb[8].mxu0 }
 0x604   :  { %999 = vrot.lane.b32.xlu0 %v1507_v11, %s1767_s10  ;;  %v812_v14 = vpop.f32.mrb[9].mxu0  ;;  %v41_v11 = vld [vmem:[%s2073_s3 + $0x28] sm:$0xff] }
 0x605   :  { %997 = vrot.lane.b32.xlu1 %v812_v14, %s1767_s10 }
 0x608   :  { %1007 = vrot.lane.b32.xlu0 %v1514_v19, %s1770_s13 }
 0x609   :  { %1005 = vrot.lane.b32.xlu1 %v899_v10, %s1770_s13  ;;  %v40_v10 = vld [vmem:[%s2073_s3 + $0x20] sm:$0xff] }
 0x60a   :  { %v1627_v14 = vpack.c.bf16 %v41_v11, %v40_v10 }
 0x636   :  { %v1521_v15 = vpop.f32.mrb[10].mxu0 }
 0x637   :  { %v986_v17 = vpop.f32.mrb[11].mxu0  ;;  %1015 = vrot.lane.b32.xlu0 %v1521_v15, %s1771_s14  ;;  %v42_v15 = vld [vmem:[%s2073_s3 + $0x30] sm:$0xff] }
 0x638   :  { %1013 = vrot.lane.b32.xlu1 %v986_v17, %s1771_s14  ;;  %v43_v17 = vld [vmem:[%s2073_s3 + $0x38] sm:$0xff] }
 0x676   :  { %v1000_v12 = vpop.permute.xlu0 %999 }
 0x677   :  { %v998_v13 = vpop.permute.xlu1 %997  ;;  %v1020_v24 = vsel %vm235_vm1, %v1500_v9, %v1000_v12  ;;  %v38_v9 = vld [vmem:[%s2073_s3 + $0x10] sm:$0xff]  ;;  %v1631_v12 = vpack.c.bf16 %v43_v17, %v42_v15 }
 0x678   :  { %v1019_v21 = vsel %vm235_vm1, %v725_v16, %v998_v13  ;;  %v39_v16 = vld [vmem:[%s2073_s3 + $0x18] sm:$0xff]  ;;  %v44_v13 = vld [vmem:[%s2073_s3 + $0x40] sm:$0xff] }
 0x679   :  { %v1623_v19 = vpack.c.bf16 %v39_v16, %v38_v9 }
 0x67a   :  { %v1008_v18 = vpop.permute.xlu0 %1007 }
 0x67b   :  { %v1006_v20 = vpop.permute.xlu1 %1005  ;;  %v1022_v44 = vsel %vm558_vm3, %v1020_v24, %v1008_v18  ;;  %1624 = vmatprep.subr.bf16.mxu1 %v1623_v19  ;;  %v45_v18 = vld [vmem:[%s2073_s3 + $0x48] sm:$0xff] }
 0x67c   :  { %v1021_v25 = vsel %vm558_vm3, %v1019_v21, %v1006_v20  ;;  %1626 = vmatpush3.bf16.msra.mxu1 %v1623_v19  ;;  %v46_v20 = vld [vmem:[%s2073_s3 + $0x50] sm:$0xff]  ;;  %v1635_v21 = vpack.c.bf16 %v45_v18, %v44_v13 }
 0x67d   :  { %1628 = vmatprep.subr.bf16.mxu1 %v1627_v14 }
 0x680   :  { %1630 = vmatpush3.bf16.msra.mxu1 %v1627_v14 }
 0x681   :  { %1632 = vmatprep.subr.bf16.mxu1 %v1631_v12 }
 0x684   :  { %1634 = vmatpush3.bf16.msra.mxu1 %v1631_v12 }
 0x685   :  { %1636 = vmatprep.subr.bf16.mxu1 %v1635_v21 }
 0x688   :  { %1638 = vmatpush3.bf16.msra.mxu1 %v1635_v21 }
 0x6a9   :  { %v1016_v22 = vpop.permute.xlu0 %1015 }
 0x6aa   :  { %v1014_v26 = vpop.permute.xlu1 %1013  ;;  %v1025_v50 = vsel %vm1023_vm4, %v1022_v44, %v1016_v22  ;;  %v47_v22 = vld [vmem:[%s2073_s3 + $0x58] sm:$0xff] }
 0x6ab   :  { %v1024_v55 = vsel %vm1023_vm4, %v1021_v25, %v1014_v26  ;;  %v1639_v24 = vpack.c.bf16 %v47_v22, %v46_v20  ;;  %v48_v25 = vld [vmem:[%s2073_s3 + $0x60] sm:$0xff]  ;;  %v49_v26 = vld [vmem:[%s2073_s3 + $0x68] sm:$0xff] }
 0x6ac   :  { %1530 = vmatprep.mubr.msk.f32.mxu0 %vm52_vm0, %v1024_v55  ;;  %v1643_v44 = vpack.c.bf16 %v49_v26, %v48_v25  ;;  %v50_v55 = vld [vmem:[%s2073_s3 + $0x70] sm:$0xff] }
 0x6ad   :  { %1531 = vmatmul.mubr.msk.f32.vlgmr.msra.gmra.mrb[12].mxu0 %vm52_vm0, %v1025_v50  ;;  %1640 = vmatprep.subr.bf16.mxu1 %v1639_v24  ;;  %v51_v50 = vld [vmem:[%s2073_s3 + $0x78] sm:$0xff] }
 0x6ae   :  { %1614 = vmatpush3.bf16.msra.mxu0 %v1611_v45  ;;  %1642 = vmatpush3.bf16.msra.mxu1 %v1639_v24 }
 0x6af   :  { %1616 = vmatprep.subr.bf16.mxu0 %v1615_v46  ;;  %1644 = vmatprep.subr.bf16.mxu1 %v1643_v44 }
 0x6b2   :  { %1618 = vmatpush3.bf16.msra.mxu0 %v1615_v46  ;;  %1646 = vmatpush3.bf16.msra.mxu1 %v1643_v44 }
 0x780   :  { %v1532_v27 = vpop.f32.mrb[12].mxu0 }
 0x781   :  { %v1124_v23 = vadd.f32 %v1532_v27, %v1390_v53  ;;  %v1118_v28 = vpop.f32.mrb[13].mxu0  ;;  %v1395_v27 = vld [vmem:[%s2071_s1 + $0x6] ss:$0 sm:$0xff] }
 0x782   :  { %v1119_v29 = vadd.f32 %v1390_v53, %v1118_v28  ;;  %v1647_v53 = vpack.c.bf16 %v51_v50, %v50_v55 }
 0x783   :  { %v1966_v30 = vadd.f32 %v1124_v23, %v1807_v1 }
 0x784   :  { %v1969_v31 = vadd.f32 %v1119_v29, %v1802_v0  ;;  %1648 = vmatprep.subr.bf16.mxu1 %v1647_v53 }
 0x785   :  { %v1132_v51 = vsel %vm52_vm0, %v1966_v30, 0.0  ;;  %1650 = vmatpush3.bf16.msra.mxu1 %v1647_v53 }
 0x786   :  { %1133 = vadd.xlane.f32.xlu0 %v1132_v51  ;;  %v1129_v58 = vsel %vm52_vm0, %v1969_v31, 0.0 }
 0x787   :  { %1130 = vadd.xlane.f32.xlu1 %v1129_v58 }
 0x813   :  { %v1134_v32 = vpop.xlane.xlu0 %1133 }
 0x814   :  { %v1136_v33 = vmul.f32 0.03125, %v1134_v32  ;;  %v1131_v34 = vpop.xlane.xlu1 %1130 }
 0x815   :  { %v1135_v35 = vmul.f32 0.03125, %v1131_v34 }
 0x816   :  { %v1138_v36 = vsub.f32 %v1966_v30, %v1136_v33 }
 0x817   :  { %v1137_v1 = vsub.f32 %v1969_v31, %v1135_v35 }
 0x818   :  { %v1140_v38 = vmul.f32 %v1138_v36, %v1138_v36 }
 0x819   :  { %v1139_v37 = vmul.f32 %v1137_v1, %v1137_v1 }
 0x81a   :  { %v1144_v40 = vsel %vm52_vm0, %v1140_v38, 0.0 }
 0x81b   :  { %v1141_v0 = vsel %vm52_vm0, %v1139_v37, 0.0 }
 0x81c   :  { %1142 = vadd.xlane.f32.xlu0 %v1141_v0 }
 0x820   :  { %1145 = vadd.xlane.f32.xlu0 %v1144_v40 }
 0x8a9   :  { %v1143_v52 = vpop.xlane.xlu0 %1142 }
 0x8aa   :  { %v1147_v54 = vmul.f32 0.03125, %v1143_v52 }
 0x8ac   :  { %v1149_v56 = vadd.f32 1e-05, %v1147_v54 }
 0x8ad   :  { %v1146_v59 = vpop.xlane.xlu0 %1145 }
 0x8ae   :  { %1730 = vrsqrt.f32 %v1149_v56  ;;  %v1148_v60 = vmul.f32 0.03125, %v1146_v59 }
 0x8b0   :  { %v1150_v61 = vadd.f32 1e-05, %v1148_v60 }
 0x8b2   :  { %1732 = vrsqrt.f32 %v1150_v61 }
 0x8b8   :  { %v1731_v62 = vpop.eup %1730 }
 0x8b9   :  { %v1153_v63 = vmul.f32 %v1731_v62, %v1137_v1 }
 0x8bb   :  { %v1159_v3 = vmul.f32 %v1393_v57, %v1153_v63 }
 0x8bc   :  { %v1733_v4 = vpop.eup %1732 }
 0x8bd   :  { %v1154_v5 = vmul.f32 %v1733_v4, %v1138_v36  ;;  %v1165_v6 = vadd.f32 %v1394_v2, %v1159_v3 }
 0x8bf   :  { %v1160_v7 = vmul.f32 %v1393_v57, %v1154_v5  ;;  %1541 = vmatprep.mubr.msk.f32.mxu0 %vm52_vm0, %v1165_v6 }
 0x8c1   :  { %v1166_v8 = vadd.f32 %v1394_v2, %v1160_v7 }
 0x8c3   :  { %1542 = vmatmul.mubr.msk.f32.vlgmr.msra.gmra.mrb[14].mxu0 %vm52_vm0, %v1166_v8 }
 0x996   :  { %v1543_v23 = vpop.f32.mrb[14].mxu0 }
 0x997   :  { %v1249_v28 = vadd.f32 %v1543_v23, %v1395_v27  ;;  %v1243_v29 = vpop.f32.mrb[15].mxu0 }
 0x998   :  { %v1244_v51 = vadd.f32 %v1395_v27, %v1243_v29 }
 0x999   :  { %v1255_v58 = vmul.f32 0.044715, %v1249_v28  ;;  %v1253_v41 = vmul.f32 0.5, %v1249_v28 }
 0x99a   :  { %v1254_v32 = vmul.f32 0.044715, %v1244_v51  ;;  %v1252_v45 = vmul.f32 0.5, %v1244_v51 }
 0x99b   :  { %v1257_v33 = vmul.f32 %v1255_v58, %v1249_v28 }
 0x99c   :  { %v1256_v34 = vmul.f32 %v1254_v32, %v1244_v51 }
 0x99d   :  { %v1259_v35 = vmul.f32 %v1257_v33, %v1249_v28 }
 0x99e   :  { %v1258_v36 = vmul.f32 %v1256_v34, %v1244_v51 }
 0x99f   :  { %v1261_v1 = vadd.f32 %v1259_v35, %v1249_v28 }
 0x9a0   :  { %v1260_v37 = vadd.f32 %v1258_v36, %v1244_v51 }
 0x9a1   :  { %v1263_v0 = vmul.f32 0.7978846, %v1261_v1 }
 0x9a2   :  { %v1262_v38 = vmul.f32 0.7978846, %v1260_v37 }
 0x9a3   :  { %1734 = vtanh.f32 %v1263_v0 }
 0x9a4   :  { %1736 = vtanh.f32 %v1262_v38 }
 0x9ad   :  { %v1735_v40 = vpop.eup %1734 }
 0x9ae   :  { %v1737_v42 = vpop.eup %1736  ;;  %v1267_v43 = vadd.f32 1.0, %v1735_v40 }
 0x9af   :  { %v1266_v39 = vadd.f32 1.0, %v1737_v42 }
 0x9b0   :  { %v1269_v47 = vmul.f32 %v1267_v43, %v1253_v41 }
 0x9b1   :  { %v1268_v46 = vmul.f32 %v1266_v39, %v1252_v45 }
 0x9b3   :  { %1576 = vmatprep.mubr.f32.mxu1 %v1268_v46 }
 0x9b4   :  { %1577 = vmatmul.mubr.f32.vlgmr.msra.gmra.mrb[6].mxu1 %v1269_v47 }
 0xa87   :  { %v1578_v49 = vpop.f32.mrb[6].mxu1 }
 0xa88   :  { %v1346_v52 = vadd.f32 %v1578_v49, %v1398_v48  ;;  %v1340_v54 = vpop.f32.mrb[7].mxu1 }
 0xa89   :  { %v1341_v56 = vadd.f32 %v1398_v48, %v1340_v54 }
 0xa8a   :  { %v1350_v59 = vadd.f32 %v1346_v52, %v1966_v30 }
 0xa8b   :  { %v1349_v60 = vadd.f32 %v1341_v56, %v1969_v31 }
 0xa8c   :  { %1352 = vst.msk [vmem:[#allocation2 + $0x8] sm:$0xff] %vm52_vm0, %v1350_v59 }
 0xa8d   :  { %1351 = vst.msk [vmem:[#allocation2] sm:$0xff] %vm52_vm0, %v1349_v60 }
 0xa8e   :  { %1749 = shalt.err (!%p1746_p4)
}
 0xa8f   :  { %s1750_s14 = scalar_lea.hbm %s2074_s4, 256 }
 0xa90   :  { %p1751_p5 = scmp.ne.s32.totalorder %s2074_s4, %s1750_s14  ;;  %p1754_p6 = scmp.lt.u32.totalorder %s1750_s14, %s2074_s4 }
 0xa92   :  { %p1756_p7 = pnand %p1754_p6, %p1751_p5 }
 0xa94   :  { %1759 = shalt.err (!%p1756_p7)
}
 0xa95   :  { %s1773_s0 = smov 128  }
 0xa96   :  { %1364 = dma.vmem_to_hbm [thread:$0]  %s1359_s11, 256, %s2074_s4, [#allocation3], %s1773_s0, %s1773_s0, %s1767_s10  }
 0xa97   :  { %1760 = dma.done.wait [#allocation3], 256  }
 0xa98   :  { %1761 = vsyncadd [#allocation3], 4294967040 }
 0xa99   :  { %1368 = vsyncpa [#allocation3], 1 }

</bundles_post_ra>
